<compile_context>
chip_gen: v5e
topology: v5e:2x2
jax: 0.10.0
libtpu: 0.0.40
codegen_flags: <defaults>
</compile_context>

<pallas_src>
import jax
import jax.numpy as jnp
from jax.experimental import pallas as pl
from jax.experimental.pallas import tpu as pltpu


def mlp_kernel(x_ref, w1_ref, b1_ref, w2_ref, b2_ref, w3_ref, b3_ref, o_ref):
    """One batch tile of the 3-layer MLP, entirely in VMEM."""
    x = x_ref[...]

    # Layer 1: (TB, D) @ (D, H) + (1, H), ReLU
    h1 = jnp.dot(x, w1_ref[...], preferred_element_type=jnp.float32) + b1_ref[...]
    h1 = jnp.maximum(h1, 0.0)

    # Layer 2: (TB, H) @ (H, H) + (1, H), ReLU
    h2 = jnp.dot(h1, w2_ref[...], preferred_element_type=jnp.float32) + b2_ref[...]
    h2 = jnp.maximum(h2, 0.0)

    # Layer 3 (head): (TB, H) @ (H, 1) + (1, 1) -- narrow K=32/N=1 dot, no padded MXU pass.
    out = jnp.dot(h2, w3_ref[...], preferred_element_type=jnp.float32) + b3_ref[...]
    o_ref[...] = out.astype(o_ref.dtype)


def _round_up(n, m):
    return (n + m - 1) // m * m


def baseline_model_forward(x, params, *, tb=2048):
    """Pallas wrapper. x: (B, input_dim) f32. params: dict of weights/biases.

    Tiles the batch with a 1-D grid of pl.cdiv(B, tb) steps (Pallas masks the boundary
    block), keeps weights/biases VMEM-resident via constant index_maps, and writes a narrow
    (B, 1) output directly (no padding, no post-slice copies).
    """
    w1, b1, w2, b2, w3, b3 = (
        params["w1"], params["b1"], params["w2"],
        params["b2"], params["w3"], params["b3"],
    )
    B, D = x.shape
    H = w1.shape[1]
    O = w3.shape[1]

    # Batch tile: adapt down for small batches, always a multiple of 8 (sublane rule).
    tb = max(8, min(tb, _round_up(B, 8)))
    tb = _round_up(tb, 8)
    grid = (pl.cdiv(B, tb),)

    out = pl.pallas_call(
        mlp_kernel,
        out_shape=jax.ShapeDtypeStruct((B, O), jnp.float32),
        grid=grid,
        in_specs=[
            pl.BlockSpec((tb, D), lambda i: (i, 0)),    # x: tiled over batch (pipelined)
            pl.BlockSpec((D, H), lambda i: (0, 0)),     # w1: resident
            pl.BlockSpec((1, H), lambda i: (0, 0)),     # b1: resident
            pl.BlockSpec((H, H), lambda i: (0, 0)),     # w2: resident
            pl.BlockSpec((1, H), lambda i: (0, 0)),     # b2: resident
            pl.BlockSpec((H, O), lambda i: (0, 0)),     # w3: resident (32, 1)
            pl.BlockSpec((1, O), lambda i: (0, 0)),     # b3: resident (1, 1)
        ],
        out_specs=pl.BlockSpec((tb, O), lambda i: (i, 0)),
        compiler_params=pltpu.CompilerParams(
            dimension_semantics=("parallel",),          # batch rows are independent
        ),
    )(x, w1, b1, w2, b2, w3, b3)

    return out


def init_params(key, input_dim, hidden, output_dim):
    """Deterministic init mimicking nn.Linear's uniform(-1/sqrt(fan_in), 1/sqrt(fan_in))."""
    ks = jax.random.split(key, 6)

    def lin(kw, kb, fan_in, fan_out):
        bound = 1.0 / jnp.sqrt(jnp.float32(fan_in))
        w = jax.random.uniform(kw, (fan_in, fan_out), jnp.float32, -bound, bound)
        b = jax.random.uniform(kb, (1, fan_out), jnp.float32, -bound, bound)
        return w, b

    w1, b1 = lin(ks[0], ks[1], input_dim, hidden)
    w2, b2 = lin(ks[2], ks[3], hidden, hidden)
    w3, b3 = lin(ks[4], ks[5], hidden, output_dim)
    return {"w1": w1, "b1": b1, "w2": w2, "b2": b2, "w3": w3, "b3": b3}


def reference_forward(x, p):
    h1 = jnp.maximum(x @ p["w1"] + p["b1"], 0.0)
    h2 = jnp.maximum(h1 @ p["w2"] + p["b2"], 0.0)
    return h2 @ p["w3"] + p["b3"]


if __name__ == "__main__":
    INPUT_DIM = 16
    HIDDEN = 32       # matches self.hidden_layer = 32
    OUTPUT_DIM = 1    # baseline head: scalar value per state
    BATCH = 8         # small correctness check (single grid step)

    key = jax.random.PRNGKey(0)
    kx, kp, kx2 = jax.random.split(key, 3)
    params = init_params(kp, INPUT_DIM, HIDDEN, OUTPUT_DIM)

    # Small-batch check (single grid step, tb adapted down to 8).
    x = jax.random.normal(kx, (BATCH, INPUT_DIM), jnp.float32)
    out = jax.block_until_ready(baseline_model_forward(x, params))
    ref = reference_forward(x, params)
    assert out.shape == (BATCH, OUTPUT_DIM)
    assert jnp.allclose(out, ref, atol=1e-5, rtol=1e-5)

    # Larger batch NOT a multiple of tb: exercises the multi-step batch grid, VMEM-resident
    # weights, and the Pallas-handled boundary block (no wrapper-side padding copy).
    BIG = 1000
    xb = jax.random.normal(kx2, (BIG, INPUT_DIM), jnp.float32)
    outb = jax.block_until_ready(baseline_model_forward(xb, params, tb=256))
    refb = reference_forward(xb, params)
    assert outb.shape == (BIG, OUTPUT_DIM)
    assert jnp.allclose(outb, refb, atol=1e-5, rtol=1e-5)

    print("KERNEL_OK")
</pallas_src>

<mosaic_0001>
module attributes {stable_mosaic.version = 11 : i64} {
  func.func @mlp_kernel(%arg0: i32, %arg1: memref<8x16xf32, #tpu.memory_space<vmem>>, %arg2: memref<16x32xf32, #tpu.memory_space<vmem>>, %arg3: memref<1x32xf32, #tpu.memory_space<vmem>>, %arg4: memref<32x32xf32, #tpu.memory_space<vmem>>, %arg5: memref<1x32xf32, #tpu.memory_space<vmem>>, %arg6: memref<32x1xf32, #tpu.memory_space<vmem>>, %arg7: memref<1x1xf32, #tpu.memory_space<vmem>>, %arg8: memref<8x1xf32, #tpu.memory_space<vmem>>) attributes {dimension_semantics = [#tpu.dimension_semantics<parallel>], iteration_bounds = array<i64: 1>, scalar_prefetch = 0 : i64, scratch_operands = 0 : i64, tpu.core_type = #tpu.core_type<tc>, window_params = [{transform_indices = @transform_0, window_bounds = array<i64: 8, 16>}, {pipeline_mode = #tpu.pipeline_mode<synchronous>, transform_indices = @transform_1, window_bounds = array<i64: 16, 32>}, {pipeline_mode = #tpu.pipeline_mode<synchronous>, transform_indices = @transform_2, window_bounds = array<i64: 1, 32>}, {pipeline_mode = #tpu.pipeline_mode<synchronous>, transform_indices = @transform_3, window_bounds = array<i64: 32, 32>}, {pipeline_mode = #tpu.pipeline_mode<synchronous>, transform_indices = @transform_4, window_bounds = array<i64: 1, 32>}, {pipeline_mode = #tpu.pipeline_mode<synchronous>, transform_indices = @transform_5, window_bounds = array<i64: 32, 1>}, {pipeline_mode = #tpu.pipeline_mode<synchronous>, transform_indices = @transform_6, window_bounds = array<i64: 1, 1>}, {transform_indices = @transform_7, window_bounds = array<i64: 8, 1>}]} {
    %c0 = arith.constant 0 : index
    %c0_0 = arith.constant 0 : index
    %0 = vector.load %arg1[%c0, %c0_0] : memref<8x16xf32, #tpu.memory_space<vmem>>, vector<8x16xf32>
    %c0_1 = arith.constant 0 : index
    %c0_2 = arith.constant 0 : index
    %1 = vector.load %arg2[%c0_1, %c0_2] : memref<16x32xf32, #tpu.memory_space<vmem>>, vector<16x32xf32>
    %cst = arith.constant dense<0.000000e+00> : vector<8x32xf32>
    %2 = tpu.matmul %0, %1, %cst {dimension_numbers = #tpu.dot_dimension_numbers<[1], [0], [0], [1], [0, 0, 1, 1], [], []>} : vector<8x16xf32>, vector<16x32xf32>, vector<8x32xf32> -> vector<8x32xf32>
    %c0_3 = arith.constant 0 : index
    %c0_4 = arith.constant 0 : index
    %3 = vector.load %arg3[%c0_3, %c0_4] : memref<1x32xf32, #tpu.memory_space<vmem>>, vector<1x32xf32>
    %4 = vector.broadcast %3 : vector<1x32xf32> to vector<8x32xf32>
    %5 = arith.addf %2, %4 : vector<8x32xf32>
    %cst_5 = arith.constant 0.000000e+00 : f32
    %6 = vector.broadcast %cst_5 : f32 to vector<8x32xf32>
    %7 = arith.maximumf %5, %6 : vector<8x32xf32>
    %c0_6 = arith.constant 0 : index
    %c0_7 = arith.constant 0 : index
    %8 = vector.load %arg4[%c0_6, %c0_7] : memref<32x32xf32, #tpu.memory_space<vmem>>, vector<32x32xf32>
    %cst_8 = arith.constant dense<0.000000e+00> : vector<8x32xf32>
    %9 = tpu.matmul %7, %8, %cst_8 {dimension_numbers = #tpu.dot_dimension_numbers<[1], [0], [0], [1], [0, 0, 1, 1], [], []>} : vector<8x32xf32>, vector<32x32xf32>, vector<8x32xf32> -> vector<8x32xf32>
    %c0_9 = arith.constant 0 : index
    %c0_10 = arith.constant 0 : index
    %10 = vector.load %arg5[%c0_9, %c0_10] : memref<1x32xf32, #tpu.memory_space<vmem>>, vector<1x32xf32>
    %11 = vector.broadcast %10 : vector<1x32xf32> to vector<8x32xf32>
    %12 = arith.addf %9, %11 : vector<8x32xf32>
    %cst_11 = arith.constant 0.000000e+00 : f32
    %13 = vector.broadcast %cst_11 : f32 to vector<8x32xf32>
    %14 = arith.maximumf %12, %13 : vector<8x32xf32>
    %c0_12 = arith.constant 0 : index
    %c0_13 = arith.constant 0 : index
    %15 = vector.load %arg6[%c0_12, %c0_13] : memref<32x1xf32, #tpu.memory_space<vmem>>, vector<32x1xf32>
    %cst_14 = arith.constant dense<0.000000e+00> : vector<8x1xf32>
    %16 = tpu.matmul %14, %15, %cst_14 {dimension_numbers = #tpu.dot_dimension_numbers<[1], [0], [0], [1], [0, 0, 1, 1], [], []>} : vector<8x32xf32>, vector<32x1xf32>, vector<8x1xf32> -> vector<8x1xf32>
    %c0_15 = arith.constant 0 : index
    %c0_16 = arith.constant 0 : index
    %17 = vector.load %arg7[%c0_15, %c0_16] : memref<1x1xf32, #tpu.memory_space<vmem>>, vector<1x1xf32>
    %18 = vector.broadcast %17 : vector<1x1xf32> to vector<8x1xf32>
    %19 = arith.addf %16, %18 : vector<8x1xf32>
    %c0_17 = arith.constant 0 : index
    %c0_18 = arith.constant 0 : index
    %20 = vector.load %arg8[%c0_17, %c0_18] : memref<8x1xf32, #tpu.memory_space<vmem>>, vector<8x1xf32>
    tpu.vector_store %arg8[%c0_17, %c0_18], %19 {strides = array<i32>} : memref<8x1xf32, #tpu.memory_space<vmem>>, vector<8x1xf32>,
    return
  }
  func.func @transform_0(%arg0: i32) -> (i32, i32) {
    %c0_i32 = arith.constant 0 : i32
    %c0_i32_0 = arith.constant 0 : i32
    return %arg0, %c0_i32 : i32, i32
  }
  func.func @transform_1(%arg0: i32) -> (i32, i32) {
    %c0_i32 = arith.constant 0 : i32
    %c0_i32_0 = arith.constant 0 : i32
    %c0_i32_1 = arith.constant 0 : i32
    return %c0_i32, %c0_i32_0 : i32, i32
  }
  func.func @transform_2(%arg0: i32) -> (i32, i32) {
    %c0_i32 = arith.constant 0 : i32
    %c0_i32_0 = arith.constant 0 : i32
    %c0_i32_1 = arith.constant 0 : i32
    return %c0_i32, %c0_i32_0 : i32, i32
  }
  func.func @transform_3(%arg0: i32) -> (i32, i32) {
    %c0_i32 = arith.constant 0 : i32
    %c0_i32_0 = arith.constant 0 : i32
    %c0_i32_1 = arith.constant 0 : i32
    return %c0_i32, %c0_i32_0 : i32, i32
  }
  func.func @transform_4(%arg0: i32) -> (i32, i32) {
    %c0_i32 = arith.constant 0 : i32
    %c0_i32_0 = arith.constant 0 : i32
    %c0_i32_1 = arith.constant 0 : i32
    return %c0_i32, %c0_i32_0 : i32, i32
  }
  func.func @transform_5(%arg0: i32) -> (i32, i32) {
    %c0_i32 = arith.constant 0 : i32
    %c0_i32_0 = arith.constant 0 : i32
    %c0_i32_1 = arith.constant 0 : i32
    return %c0_i32, %c0_i32_0 : i32, i32
  }
  func.func @transform_6(%arg0: i32) -> (i32, i32) {
    %c0_i32 = arith.constant 0 : i32
    %c0_i32_0 = arith.constant 0 : i32
    %c0_i32_1 = arith.constant 0 : i32
    return %c0_i32, %c0_i32_0 : i32, i32
  }
  func.func @transform_7(%arg0: i32) -> (i32, i32) {
    %c0_i32 = arith.constant 0 : i32
    %c0_i32_0 = arith.constant 0 : i32
    return %arg0, %c0_i32 : i32, i32
  }
}

</mosaic_0001>

<bundles_post_ra>
// kernel: tpu_custom_call.1
= control target key start
LH: loop header
LB: loop body
LE: loop exit
PB: predicated region body
PF: predicated region fallthrough
CT: control target
= control target key end

     0   :  { %s310_s0 = inlined_call_operand.hbm [shape: f32[8,16], index: 0, kind: input, shape index: {}]   ;;  %s311_s1 = inlined_call_operand.hbm [shape: f32[16,32], index: 1, kind: input, shape index: {}]   ;;  %s312_s2 = inlined_call_operand.vmem [shape: f32[1,32], index: 2, kind: input, shape index: {}]   ;;  %s313_s3 = inlined_call_operand.vmem [shape: f32[32,32], index: 3, kind: input, shape index: {}]   ;;  %s314_s4 = inlined_call_operand.vmem [shape: f32[1,32], index: 4, kind: input, shape index: {}]   ;;  %s315_s5 = inlined_call_operand.vmem [shape: f32[32,1], index: 5, kind: input, shape index: {}]   ;;  %s316_s6 = inlined_call_operand.<no memory space> [shape: f32[1,1], index: 6, kind: input, shape index: {}]   ;;  %s317_s7 = inlined_call_operand.vmem [shape: f32[8,1], index: 7, kind: output, shape index: {}]  }
   0x1   :  { %v12_v0 = vstv %s316_s6 }
   0x2   :  { %13 = vst [vmem:[#allocation2] sm:$0x1] %v12_v0 }
   0x3   :  { %14 = vsyncpa [#allocation4], 0  ;;  %s21_s28 = sshll.u32 %s310_s0, 4  ;;  %s22_s28 = int_to_ptr.hbm [resolvable:$true] %s21_s28 }
   0x4   :  { %15 = vsyncpa [#allocation6], 0  ;;  %s224_s29 = smov [#allocation3]   ;;  %s31_s10 = sshll.u32 %s311_s1, 4  ;;  %s32_s10 = int_to_ptr.hbm [resolvable:$true] %s31_s10 }
   0x5   :  { %s23_s30 = sshll.u32 %s224_s29, 4  ;;  %s225_s11 = smov [#allocation5]   ;;  %s24_s30 = int_to_ptr.vmem [resolvable:$true] %s23_s30 }
   0x6   :  { %26 = dma.hbm_to_vmem [thread:$0]  %s22_s28, 128, %s24_s30, [#allocation4]  }
   0x7   :  { %s33_s12 = sshll.u32 %s225_s11, 4  ;;  %s226_s6 = smov 128   ;;  %s34_s12 = int_to_ptr.vmem [resolvable:$true] %s33_s12 }
   0x8   :  { %s227_s13 = smov 8  }
   0x9   :  { %39 = dma.hbm_to_vmem [thread:$0]  %s32_s10, 256, %s34_s12, [#allocation6], %s226_s6, %s226_s6, %s227_s13  }
   0xa   :  { %220 = dma.done.wait [#allocation4], 128  }
   0xb   :  { %221 = vsyncadd [#allocation4], 4294967168 }
   0xc   :  { %222 = dma.done.wait [#allocation6], 256  }
   0xd   :  { %223 = vsyncadd [#allocation6], 4294967040  ;;  %v60_v1 = vld [vmem:[#allocation5 + $0x8] sm:$0xff]  ;;  %v59_v2 = vld [vmem:[#allocation5] sm:$0xff]  ;;  %vm65_vm0 = vcmask 130048   ;;  %vm98_vm1 = vcmask 261120  }
   0xe   :  { %83 = vmatpush.msra.mxu0 %v60_v1  ;;  %v58_v3 = vld [vmem:[#allocation3] sm:$0xff]  ;;  %v93_v4 = vld [vmem:[%s313_s3 + $0x18] sm:$0xff]  ;;  %v92_v5 = vld [vmem:[%s313_s3 + $0x10] sm:$0xff]  ;;  %vm154_vm2 = vcmask 7168  }
   0xf   :  { %114 = vmatpush.msra.mxu1 %v93_v4  ;;  %v91_v6 = vld [vmem:[%s313_s3 + $0x8] sm:$0xff]  ;;  %v90_v7 = vld [vmem:[%s313_s3] sm:$0xff]  ;;  %v126_v8 = vld [vmem:[%s315_s5 + $0x18] sm:$0xff] }
  0x10   :  { %84 = vmatpush.msra.mxu0 %v59_v2  ;;  %146 = vmatpush.msra.mxu2 %v126_v8  ;;  %v169_v9 = vld [vmem:[%s312_s2] ss:$0 sm:$0xff]  ;;  %v125_v13 = vld [vmem:[%s315_s5 + $0x10] sm:$0xff]  ;;  %v124_v14 = vld [vmem:[%s315_s5 + $0x8] sm:$0xff] }
  0x11   :  { %162 = vmatmul.msk.f32.vlgmr.msra.gmra.mxu0 %vm65_vm0, %v58_v3  ;;  %115 = vmatpush.msra.mxu1 %v92_v5  ;;  %v123_v15 = vld [vmem:[%s315_s5] sm:$0xff] }
  0x12   :  { %147 = vmatpush.msra.mxu2 %v125_v13  ;;  %v170_v16 = vld [vmem:[%s314_s4] ss:$0 sm:$0xff] }
  0x13   :  { %116 = vmatpush.msra.mxu1 %v91_v6  ;;  %v171_v20 = vld [vmem:[#allocation2] ss:$0 sm:$0xff] }
  0x14   :  { %148 = vmatpush.msra.mxu2 %v124_v14 }
  0x15   :  { %117 = vmatpush.msra.mxu1 %v90_v7 }
  0x16   :  { %149 = vmatpush.msra.mxu2 %v123_v15 }
  0x8e   :  { %v86_v10 = vpop.f32.mrf.mxu0 }
  0x8f   :  { %v87_v11 = vadd.f32 %v169_v9, %v86_v10 }
  0x91   :  { %v89_v12 = vmax.f32 %v87_v11, 0.0 }
  0x93   :  { %163 = vmatmul.msk.f32.vlgmr.msra.gmra.mxu1 %vm98_vm1, %v89_v12 }
 0x110   :  { %v119_v17 = vpop.f32.mrf.mxu1 }
 0x111   :  { %v120_v18 = vadd.f32 %v170_v16, %v119_v17 }
 0x113   :  { %v122_v19 = vmax.f32 %v120_v18, 0.0 }
 0x115   :  { %164 = vmatmul.msk.f32.vlgmr.msra.gmra.mxu2 %vm98_vm1, %v122_v19 }
 0x198   :  { %v151_v21 = vpop.f32.mrf.mxu2 }
 0x199   :  { %v152_v22 = vadd.f32 %v171_v20, %v151_v21 }
 0x19b   :  { %155 = vst.msk [vmem:[%s317_s7] sm:$0xff] %vm154_vm2, %v152_v22 }
 0x19c   :  { %160 = vsyncpa [#allocation4], 1 }
 0x19d   :  { %161 = vsyncpa [#allocation6], 1 }

</bundles_post_ra>
